<compile_context>
chip_gen: v6e
topology: v6e:2x2x1
jax: 0.10.0
libtpu: 0.0.40
codegen_flags: <defaults>
</compile_context>

<pallas_src>
import functools

import jax
import jax.numpy as jnp
from jax.experimental import pallas as pl
from jax.experimental.pallas import tpu as pltpu


def _round_up(n: int, m: int) -> int:
    return ((n + m - 1) // m) * m


def collapsed_mlp_kernel(x_ref, wc_ref, bc_ref, o_ref):
    # x_ref : (TM, IN)      f32   (streamed over batch, pipelined by BlockSpec)
    # wc_ref: (IN, OUT_PAD) bf16  (constant index_map -> resident in VMEM)
    # bc_ref: (1,  OUT_PAD) f32   (resident)
    # o_ref : (TM, OUT_PAD) f32
    x = x_ref[...].astype(wc_ref.dtype)   # VPU cast; HBM read stays f32 (no copy)
    o_ref[...] = (jnp.dot(x, wc_ref[...], preferred_element_type=jnp.float32)
                  + bc_ref[...]).astype(o_ref.dtype)


def prepare_params(w1, b1, w2, b2, *, compute_dtype=jnp.bfloat16):
    """One-time weight prep — keep this OUT of the per-call path.

    Collapses the two activation-free Linear layers and pads the 10-wide
    output to 128 lanes so the kernel's stores are unmasked.
    Returns (wc_pad (784,128) bf16, bc_pad (1,128) f32).
    """
    in_dim, hid = w1.shape
    out_dim = w2.shape[1]
    out_pad = _round_up(out_dim, 128)                    # 10 -> 128

    w1f = w1.astype(jnp.float32)
    w2f = w2.astype(jnp.float32)
    b1f = b1.reshape(1, hid).astype(jnp.float32)
    b2f = b2.reshape(1, out_dim).astype(jnp.float32)

    # Collapse in f32 so the error vs. PyTorch f32 semantics stays small.
    wc = jnp.dot(w1f, w2f, preferred_element_type=jnp.float32)        # (784, 10)
    bc = jnp.dot(b1f, w2f, preferred_element_type=jnp.float32) + b2f  # (1, 10)

    wc_pad = jnp.zeros((in_dim, out_pad), compute_dtype)
    wc_pad = wc_pad.at[:, :out_dim].set(wc.astype(compute_dtype))
    bc_pad = jnp.zeros((1, out_pad), jnp.float32)
    bc_pad = bc_pad.at[:, :out_dim].set(bc)
    return wc_pad, bc_pad


@functools.partial(jax.jit, static_argnames=("out_dim", "tm"))
def neural_net_forward(x_nchw, wc_pad, bc_pad, *, out_dim=10, tm=1024):
    """Forward pass of NeuralNet.

    x_nchw: (B, 1, 28, 28) f32; wc_pad/bc_pad from prepare_params().
    Returns logits (B, out_dim) f32.
    """
    B = x_nchw.shape[0]
    x_flat = x_nchw.reshape(B, -1)                       # nn.Flatten (layout no-op)
    in_dim = x_flat.shape[1]
    out_pad = wc_pad.shape[1]

    # No padded/cast copy of x. Only round the batch up to the 8-sublane
    # minimum when needed (tiny/ragged batches); typical batches are already
    # multiples of 8 -> zero-copy. Partial last batch tiles rely on Pallas
    # edge-block handling; garbage rows are sliced away below.
    b_pad = _round_up(B, 8)
    if b_pad != B:
        x_flat = jnp.pad(x_flat, ((0, b_pad - B), (0, 0)))

    # Big batch tile amortizes the ~0.35 us/step grid overhead; shrink for
    # tiny B. (For huge B on v7x the grid still has >=2 steps so the
    # "parallel" axis can be sharded across both TensorCores.)
    tm_eff = min(tm, b_pad)
    grid = (pl.cdiv(b_pad, tm_eff),)

    cost = pl.CostEstimate(
        flops=2 * b_pad * in_dim * out_pad,
        transcendentals=0,
        bytes_accessed=(b_pad * in_dim * 4                           # x (f32)
                        + in_dim * out_pad * wc_pad.dtype.itemsize   # Wc (bf16)
                        + out_pad * 4                                # bc
                        + b_pad * out_pad * 4),                      # out (f32)
    )

    out_padded = pl.pallas_call(
        collapsed_mlp_kernel,
        out_shape=jax.ShapeDtypeStruct((b_pad, out_pad), jnp.float32),
        grid_spec=pltpu.PrefetchScalarGridSpec(
            num_scalar_prefetch=0,
            grid=grid,
            in_specs=[
                # x: tiled over batch -> pipelined HBM->VMEM prefetch.
                pl.BlockSpec((tm_eff, in_dim), lambda i: (i, 0)),
                # Collapsed weight / bias: constant index_map -> VMEM-resident.
                pl.BlockSpec((in_dim, out_pad), lambda i: (0, 0)),
                pl.BlockSpec((1, out_pad), lambda i: (0, 0)),
            ],
            out_specs=pl.BlockSpec((tm_eff, out_pad), lambda i: (i, 0)),
        ),
        compiler_params=pltpu.CompilerParams(
            dimension_semantics=("parallel",),   # independent batch tiles
            vmem_limit_bytes=48 << 20,           # headroom for tm up to 2048 (v5e)
        ),
        cost_estimate=cost,
    )(x_flat, wc_pad, bc_pad)

    return out_padded[:B, :out_dim]


if __name__ == "__main__":
    key = jax.random.PRNGKey(0)
    k_x, k_w1, k_b1, k_w2, k_b2 = jax.random.split(key, 5)

    B = 2
    IN, HID, OUT = 28 * 28, 512, 10

    # Deterministic synthetic inputs / parameters (nn.Linear-style bounds).
    x = jax.random.normal(k_x, (B, 1, 28, 28), dtype=jnp.float32)
    bound1 = 1.0 / (IN ** 0.5)
    w1 = jax.random.uniform(k_w1, (IN, HID), jnp.float32, -bound1, bound1)
    b1 = jax.random.uniform(k_b1, (HID,), jnp.float32, -bound1, bound1)
    bound2 = 1.0 / (HID ** 0.5)
    w2 = jax.random.uniform(k_w2, (HID, OUT), jnp.float32, -bound2, bound2)
    b2 = jax.random.uniform(k_b2, (OUT,), jnp.float32, -bound2, bound2)

    # One-time weight prep (outside the per-call path).
    wc_pad, bc_pad = prepare_params(w1, b1, w2, b2)

    logits = neural_net_forward(x, wc_pad, bc_pad, out_dim=OUT)
    logits = jax.block_until_ready(logits)
    assert logits.shape == (B, OUT)

    # Tight check against a reference using the same collapsed-bf16 compute path.
    x_flat = x.reshape(B, -1)
    ref_bf = (jnp.dot(x_flat.astype(jnp.bfloat16), wc_pad,
                      preferred_element_type=jnp.float32) + bc_pad)[:, :OUT]
    assert jnp.allclose(logits, ref_bf, atol=2e-3, rtol=2e-3)

    # Looser check against the pure-f32 PyTorch-equivalent semantics.
    ref_f32 = (x_flat @ w1 + b1.reshape(1, -1)) @ w2 + b2.reshape(1, -1)
    assert jnp.allclose(logits, ref_f32, atol=2e-2, rtol=2e-2)

    print("KERNEL_OK")
</pallas_src>

<mosaic_0001>
module attributes {stable_mosaic.version = 11 : i64} {
  func.func @collapsed_mlp_kernel(%arg0: i32, %arg1: memref<8x784xf32, #tpu.memory_space<vmem>>, %arg2: memref<784x128xbf16, #tpu.memory_space<vmem>>, %arg3: memref<1x128xf32, #tpu.memory_space<vmem>>, %arg4: memref<8x128xf32, #tpu.memory_space<vmem>>) attributes {dimension_semantics = [#tpu.dimension_semantics<parallel>], iteration_bounds = array<i64: 1>, scalar_prefetch = 0 : i64, scratch_operands = 0 : i64, tpu.core_type = #tpu.core_type<tc>, window_params = [{transform_indices = @transform_0, window_bounds = array<i64: 8, 784>}, {pipeline_mode = #tpu.pipeline_mode<synchronous>, transform_indices = @transform_1, window_bounds = array<i64: 784, 128>}, {pipeline_mode = #tpu.pipeline_mode<synchronous>, transform_indices = @transform_2, window_bounds = array<i64: 1, 128>}, {transform_indices = @transform_3, window_bounds = array<i64: 8, 128>}]} {
    %c0 = arith.constant 0 : index
    %c0_0 = arith.constant 0 : index
    %0 = vector.load %arg1[%c0, %c0_0] : memref<8x784xf32, #tpu.memory_space<vmem>>, vector<8x784xf32>
    %1 = arith.truncf %0 : vector<8x784xf32> to vector<8x784xbf16>
    %c0_1 = arith.constant 0 : index
    %c0_2 = arith.constant 0 : index
    %2 = vector.load %arg2[%c0_1, %c0_2] : memref<784x128xbf16, #tpu.memory_space<vmem>>, vector<784x128xbf16>
    %cst = arith.constant dense<0.000000e+00> : vector<8x128xf32>
    %3 = tpu.matmul %1, %2, %cst {dimension_numbers = #tpu.dot_dimension_numbers<[1], [0], [0], [1], [0, 0, 1, 1], [], []>} : vector<8x784xbf16>, vector<784x128xbf16>, vector<8x128xf32> -> vector<8x128xf32>
    %c0_3 = arith.constant 0 : index
    %c0_4 = arith.constant 0 : index
    %4 = vector.load %arg3[%c0_3, %c0_4] : memref<1x128xf32, #tpu.memory_space<vmem>>, vector<1x128xf32>
    %5 = vector.broadcast %4 : vector<1x128xf32> to vector<8x128xf32>
    %6 = arith.addf %3, %5 : vector<8x128xf32>
    %c0_5 = arith.constant 0 : index
    %c0_6 = arith.constant 0 : index
    %7 = vector.load %arg4[%c0_5, %c0_6] : memref<8x128xf32, #tpu.memory_space<vmem>>, vector<8x128xf32>
    tpu.vector_store %arg4[%c0_5, %c0_6], %6 {strides = array<i32>} : memref<8x128xf32, #tpu.memory_space<vmem>>, vector<8x128xf32>,
    return
  }
  func.func @transform_0(%arg0: i32) -> (i32, i32) {
    %c0_i32 = arith.constant 0 : i32
    %c0_i32_0 = arith.constant 0 : i32
    return %arg0, %c0_i32 : i32, i32
  }
  func.func @transform_1(%arg0: i32) -> (i32, i32) {
    %c0_i32 = arith.constant 0 : i32
    %c0_i32_0 = arith.constant 0 : i32
    %c0_i32_1 = arith.constant 0 : i32
    return %c0_i32, %c0_i32_0 : i32, i32
  }
  func.func @transform_2(%arg0: i32) -> (i32, i32) {
    %c0_i32 = arith.constant 0 : i32
    %c0_i32_0 = arith.constant 0 : i32
    %c0_i32_1 = arith.constant 0 : i32
    return %c0_i32, %c0_i32_0 : i32, i32
  }
  func.func @transform_3(%arg0: i32) -> (i32, i32) {
    %c0_i32 = arith.constant 0 : i32
    %c0_i32_0 = arith.constant 0 : i32
    return %arg0, %c0_i32 : i32, i32
  }
}

</mosaic_0001>

<bundles_post_ra>
// kernel: neural_net_forward.1
= control target key start
LH: loop header
LB: loop body
LE: loop exit
PB: predicated region body
PF: predicated region fallthrough
CT: control target
= control target key end

     0   :  { %8 = vsyncpa [#allocation3], 0  ;;  %s813_s12 = smov [#allocation2]   ;;  %s868_s0 = inlined_call_operand.vmem [shape: f32[8,784], index: 0, kind: input, shape index: {}]   ;;  %s869_s1 = inlined_call_operand.hbm [shape: bf16[784,128], index: 1, kind: input, shape index: {}]   ;;  %s870_s2 = inlined_call_operand.vmem [shape: f32[1,128], index: 2, kind: input, shape index: {}]   ;;  %s871_s3 = inlined_call_operand.vmem [shape: f32[8,128], index: 3, kind: output, shape index: {}]  }
   0x1   :  { %s16_s13 = sshll.u32 %s813_s12, 4  ;;  %s17_s13 = int_to_ptr.vmem [resolvable:$true] %s16_s13 }
   0x2   :  { %s799_s14 = scalar_lea.vmem %s17_s13, 6272  ;;  %p804_p1 = scmp.lt.s32.totalorder %s17_s13, %s17_s13 }
   0x3   :  { %p800_p0 = scmp.ne.s32.totalorder %s17_s13, %s799_s14  ;;  %p805_p2 = scmp.lt.s32.totalorder %s799_s14, %s799_s14 }
   0x5   :  { %p806_p3 = por %p805_p2, %p804_p1 }
   0x7   :  { %p807_p4 = pnand %p806_p3, %p800_p0 }
   0x9   :  { %810 = shalt.err (!%p807_p4)
}
   0xa   :  { %s814_s15 = smov 64   ;;  %s815_s16 = smov 4  }
   0xb   :  { %22 = dma.hbm_to_vmem [thread:$0]  %s869_s1, 6272, %s17_s13, [#allocation3], %s814_s15, %s814_s15, %s815_s16  }
   0xc   :  { %811 = dma.done.wait [#allocation3], 6272  }
   0xd   :  { %812 = vsyncadd [#allocation3], 4294961024  ;;  %v742_v0 = vld [vmem:[#allocation2 + $0x78] sm:$0xff]   ;;  %v746_v4 = vld [vmem:[#allocation2 + $0x70] sm:$0xff]   ;;  %v816_v44 = vmov 0.0   ;;  %vm817_vm0 = vmmov 0  }
   0xe   :  { %v743_v1 = vld [vmem:[#allocation2 + $0x38] sm:$0xff]   ;;  %663 = vmatprep.subr.bf16.mxu0 %v742_v0  ;;  %v747_v5 = vld [vmem:[#allocation2 + $0x30] sm:$0xff]   ;;  %v750_v8 = vld [vmem:[#allocation2 + $0x68] sm:$0xff]   ;;  %vm442_vm1 = vcmask 130048  }
   0xf   :  { %v744_v2 = vld [vmem:[#allocation2 + $0xf8] sm:$0xff]   ;;  %664 = vmatpush3.bf16.msra.mxu0 %v743_v1  ;;  %v748_v6 = vld [vmem:[#allocation2 + $0xf0] sm:$0xff]   ;;  %v751_v9 = vld [vmem:[#allocation2 + $0x28] sm:$0xff]  }
  0x10   :  { %v745_v3 = vld [vmem:[#allocation2 + $0xb8] sm:$0xff]   ;;  %685 = vmatprep.subr.bf16.mxu1 %v744_v2  ;;  %665 = vmatprep.subr.bf16.mxu0 %v746_v4  ;;  %v749_v7 = vld [vmem:[#allocation2 + $0xb0] sm:$0xff]   ;;  %v752_v10 = vld [vmem:[#allocation2 + $0xe8] sm:$0xff]  }
  0x11   :  { %686 = vmatpush3.bf16.msra.mxu1 %v745_v3  ;;  %v753_v11 = vld [vmem:[#allocation2 + $0xa8] sm:$0xff]   ;;  %v754_v12 = vld [vmem:[#allocation2 + $0x60] sm:$0xff]   ;;  %v758_v16 = vld [vmem:[#allocation2 + $0x58] sm:$0xff]  }
  0x12   :  { %687 = vmatprep.subr.bf16.mxu1 %v748_v6  ;;  %v755_v13 = vld [vmem:[#allocation2 + $0x20] sm:$0xff]   ;;  %v759_v17 = vld [vmem:[#allocation2 + $0x18] sm:$0xff]   ;;  %v762_v20 = vld [vmem:[#allocation2 + $0x50] sm:$0xff]  }
  0x13   :  { %666 = vmatpush3.bf16.msra.mxu0 %v747_v5  ;;  %v756_v14 = vld [vmem:[#allocation2 + $0xe0] sm:$0xff]   ;;  %v760_v18 = vld [vmem:[#allocation2 + $0xd8] sm:$0xff]   ;;  %v763_v21 = vld [vmem:[#allocation2 + $0x10] sm:$0xff]  }
  0x14   :  { %667 = vmatprep.subr.bf16.mxu0 %v750_v8  ;;  %v757_v15 = vld [vmem:[#allocation2 + $0xa0] sm:$0xff]   ;;  %v761_v19 = vld [vmem:[#allocation2 + $0x98] sm:$0xff]   ;;  %v764_v22 = vld [vmem:[#allocation2 + $0xd0] sm:$0xff]  }
  0x15   :  { %688 = vmatpush3.bf16.msra.mxu1 %v749_v7  ;;  %v765_v23 = vld [vmem:[#allocation2 + $0x90] sm:$0xff]   ;;  %v766_v24 = vld [vmem:[#allocation2 + $0x48] sm:$0xff]   ;;  %v770_v28 = vld [vmem:[#allocation2 + $0x40] sm:$0xff]  }
  0x16   :  { %689 = vmatprep.subr.bf16.mxu1 %v752_v10  ;;  %v767_v25 = vld [vmem:[#allocation2 + $0x8] sm:$0xff]   ;;  %v771_v29 = vld [vmem:[#allocation2] sm:$0xff]   ;;  %v774_v36 = vld [vmem:[#allocation2 + $0x178] sm:$0xff]  }
  0x17   :  { %668 = vmatpush3.bf16.msra.mxu0 %v751_v9  ;;  %v768_v26 = vld [vmem:[#allocation2 + $0xc8] sm:$0xff]   ;;  %v772_v30 = vld [vmem:[#allocation2 + $0xc0] sm:$0xff]   ;;  %v32_v37 = vld [vmem:[%s868_s0 + $0x18] sm:$0xff] }
  0x18   :  { %669 = vmatprep.subr.bf16.mxu0 %v754_v12  ;;  %v769_v27 = vld [vmem:[#allocation2 + $0x88] sm:$0xff]   ;;  %v773_v33 = vld [vmem:[#allocation2 + $0x80] sm:$0xff]   ;;  %v39_v38 = vpack.c.bf16 %v32_v37, %v32_v37  ;;  %v775_v39 = vld [vmem:[#allocation2 + $0x138] sm:$0xff]  }
  0x19   :  { %690 = vmatpush3.bf16.msra.mxu1 %v753_v11  ;;  %v30_v31 = vld [vmem:[%s868_s0 + $0x8] sm:$0xff]  ;;  %v29_v34 = vld [vmem:[%s868_s0] sm:$0xff]  ;;  %v31_v40 = vld [vmem:[%s868_s0 + $0x10] sm:$0xff] }
  0x1a   :  { %691 = vmatprep.subr.bf16.mxu1 %v756_v14  ;;  %v37_v32 = vpack.c.bf16 %v30_v31, %v30_v31  ;;  %v36_v35 = vpack.c.bf16 %v29_v34, %v29_v34  ;;  %518 = vmatprep.mubr.bf16.mxu1 %v39_v38  ;;  %v38_v41 = vpack.c.bf16 %v31_v40, %v31_v40  ;;  %v776_v42 = vld [vmem:[#allocation2 + $0x170] sm:$0xff]   ;;  %v778_v45 = vld [vmem:[#allocation2 + $0x168] sm:$0xff]   ;;  %v780_v47 = vld [vmem:[#allocation2 + $0x160] sm:$0xff]  }
  0x1b   :  { %670 = vmatpush3.bf16.msra.mxu0 %v755_v13  ;;  %v777_v43 = vld [vmem:[#allocation2 + $0x130] sm:$0xff]   ;;  %v779_v46 = vld [vmem:[#allocation2 + $0x128] sm:$0xff]   ;;  %v781_v48 = vld [vmem:[#allocation2 + $0x120] sm:$0xff]  }
  0x1c   :  { %671 = vmatprep.subr.bf16.mxu0 %v758_v16  ;;  %478 = vmatprep.mubr.bf16.mxu0 %v37_v32  ;;  %v782_v49 = vld [vmem:[#allocation2 + $0x158] sm:$0xff]   ;;  %v788_v51 = vld [vmem:[#allocation2 + $0x180] sm:$0xff]   ;;  %v784_v52 = vld [vmem:[#allocation2 + $0x150] sm:$0xff]  }
  0x1d   :  { %692 = vmatpush3.bf16.msra.mxu1 %v757_v15  ;;  %v783_v50 = vld [vmem:[#allocation2 + $0x118] sm:$0xff]   ;;  %v35_v53 = vld [vmem:[%s868_s0 + $0x30] sm:$0xff]  ;;  %v34_v54 = vld [vmem:[%s868_s0 + $0x28] sm:$0xff] }
  0x1e   :  { %693 = vmatprep.subr.bf16.mxu1 %v760_v18  ;;  %v42_v55 = vpack.c.bf16 %v35_v53, %v35_v53  ;;  %v41_v56 = vpack.c.bf16 %v34_v54, %v34_v54  ;;  %v785_v57 = vld [vmem:[#allocation2 + $0x110] sm:$0xff]   ;;  %v786_v58 = vld [vmem:[#allocation2 + $0x148] sm:$0xff]   ;;  %v789_v60 = vld [vmem:[#allocation2 + $0x140] sm:$0xff]  }
  0x1f   :  { %672 = vmatpush3.bf16.msra.mxu0 %v759_v17  ;;  %v787_v59 = vld [vmem:[#allocation2 + $0x108] sm:$0xff]   ;;  %v790_v61 = vld [vmem:[#allocation2 + $0x100] sm:$0xff]  }
  0x20   :  { %673 = vmatprep.subr.bf16.mxu0 %v762_v20  ;;  %v33_v62 = vld [vmem:[%s868_s0 + $0x20] sm:$0xff] }
  0x21   :  { %694 = vmatpush3.bf16.msra.mxu1 %v761_v19  ;;  %v40_v63 = vpack.c.bf16 %v33_v62, %v33_v62  ;;  %v612_v13 = vld [vmem:[%s870_s2] ss:$0 sm:$0xff] }
  0x22   :  { %695 = vmatprep.subr.bf16.mxu1 %v764_v22 }
  0x23   :  { %674 = vmatpush3.bf16.msra.mxu0 %v763_v21 }
  0x24   :  { %675 = vmatprep.subr.bf16.mxu0 %v766_v24 }
  0x25   :  { %696 = vmatpush3.bf16.msra.mxu1 %v765_v23 }
  0x26   :  { %697 = vmatprep.subr.bf16.mxu1 %v768_v26 }
  0x27   :  { %676 = vmatpush3.bf16.msra.mxu0 %v767_v25 }
  0x28   :  { %677 = vmatprep.subr.bf16.mxu0 %v770_v28 }
  0x29   :  { %698 = vmatpush3.bf16.msra.mxu1 %v769_v27 }
  0x2a   :  { %699 = vmatprep.subr.bf16.mxu1 %v772_v30 }
  0x2b   :  { %678 = vmatpush3.bf16.msra.mxu0 %v771_v29 }
  0x2c   :  { %707 = vmatprep.subr.bf16.mxu0 %v774_v36 }
  0x2d   :  { %700 = vmatpush3.bf16.msra.mxu1 %v773_v33 }
  0x2e   :  { %479 = vmatmul.mubr.bf16.vlgmr.msra.gmra.mxu0 %v36_v35  ;;  %731 = vmatprep.subr.bf16.mxu1 %v816_v44 }
  0x2f   :  { %708 = vmatpush3.bf16.msra.mxu0 %v775_v39  ;;  %558 = vmatprep.mubr.bf16.mxu0 %v41_v56 }
  0x30   :  { %519 = vmatmul.mubr.bf16.vlgmr.msra.gmra.mxu1 %v38_v41  ;;  %709 = vmatprep.subr.bf16.mxu0 %v776_v42 }
  0x31   :  { %733 = vmatprep.mubr.msk.bf16.mxu1 %vm817_vm0, %v816_v44  ;;  %732 = vmatpush3.bf16.msra.mxu1 %v788_v51 }
  0x33   :  { %710 = vmatpush3.bf16.msra.mxu0 %v777_v43 }
  0x34   :  { %711 = vmatprep.subr.bf16.mxu0 %v778_v45 }
  0x37   :  { %712 = vmatpush3.bf16.msra.mxu0 %v779_v46 }
  0x38   :  { %713 = vmatprep.subr.bf16.mxu0 %v780_v47  ;;  %734 = vmatmul.mubr.msk.bf16.vlgmr.msra.gmra.mxu1 %vm442_vm1, %v42_v55 }
  0x3b   :  { %714 = vmatpush3.bf16.msra.mxu0 %v781_v48 }
  0x3c   :  { %715 = vmatprep.subr.bf16.mxu0 %v782_v49 }
  0x3f   :  { %716 = vmatpush3.bf16.msra.mxu0 %v783_v50 }
  0x40   :  { %717 = vmatprep.subr.bf16.mxu0 %v784_v52 }
  0x43   :  { %718 = vmatpush3.bf16.msra.mxu0 %v785_v57 }
  0x44   :  { %719 = vmatprep.subr.bf16.mxu0 %v786_v58 }
  0x47   :  { %720 = vmatpush3.bf16.msra.mxu0 %v787_v59 }
  0x48   :  { %721 = vmatprep.subr.bf16.mxu0 %v789_v60 }
  0x4b   :  { %722 = vmatpush3.bf16.msra.mxu0 %v790_v61 }
  0x4e   :  { %559 = vmatmul.mubr.bf16.vlgmr.msra.gmra.mxu0 %v40_v63 }
  0xee   :  { %v679_v0 = vpop.f32.mrf.mxu0 }
  0xf0   :  { %v680_v1 = vpop.f32.mrf.mxu0  ;;  %v701_v2 = vpop.f32.mrf.mxu1 }
  0xf1   :  { %v681_v12 = vadd.f32 %v680_v1, %v679_v0 }
  0xf2   :  { %v682_v3 = vpop.f32.mrf.mxu0  ;;  %v702_v4 = vpop.f32.mrf.mxu1 }
  0xf3   :  { %v481_v14 = vadd.f32 %v681_v12, %v612_v13  ;;  %v703_v15 = vadd.f32 %v702_v4, %v701_v2 }
  0xf4   :  { %v683_v5 = vpop.f32.mrf.mxu0  ;;  %v704_v6 = vpop.f32.mrf.mxu1 }
  0xf5   :  { %v521_v18 = vadd.f32 %v703_v15, %v481_v14 }
  0xf6   :  { %v705_v7 = vpop.f32.mrf.mxu1 }
  0xf8   :  { %v600_v8 = vpop.f32.mrf.mxu1 }
  0xfa   :  { %v735_v9 = vpop.f32.mrf.mxu1 }
  0xfc   :  { %v603_v10 = vpop.f32.mrf.mxu1 }
  0xfe   :  { %v736_v11 = vpop.f32.mrf.mxu1 }
 0x10e   :  { %v723_v16 = vpop.f32.mrf.mxu0 }
 0x110   :  { %v724_v17 = vpop.f32.mrf.mxu0 }
 0x111   :  { %v725_v19 = vadd.f32 %v724_v17, %v723_v16 }
 0x112   :  { %v726_v20 = vpop.f32.mrf.mxu0 }
 0x113   :  { %v561_v21 = vadd.f32 %v725_v19, %v521_v18 }
 0x114   :  { %v727_v22 = vpop.f32.mrf.mxu0 }
 0x115   :  { %v601_v23 = vadd.f32 %v600_v8, %v561_v21 }
 0x117   :  { %606 = vst [vmem:[%s871_s3] sm:$0xff] %v601_v23 }
 0x118   :  { %611 = vsyncpa [#allocation3], 1 }

</bundles_post_ra>
